<compile_context>
chip_gen: v6e
topology: v6e:2x2x1
jax: 0.10.0
libtpu: 0.0.40
codegen_flags: <defaults>
</compile_context>

<pallas_src>
import functools
import math

import jax
import jax.numpy as jnp
from jax.experimental import pallas as pl
from jax.experimental.pallas import tpu as pltpu


def _round_up(n, m):
    return ((n + m - 1) // m) * m


def _ffn_kernel(*refs, training: bool, dropout_p: float):
    if training:
        x_ref, w1_ref, b1_ref, w2_ref, b2_ref, bits_ref, o_ref, h_ref = refs
    else:
        x_ref, w1_ref, b1_ref, w2_ref, b2_ref, o_ref, h_ref = refs
        bits_ref = None

    # hidden = relu(x @ W1 + b1); bf16 MXU inputs, f32 accumulation.
    # Stage the (tm, H) intermediate in VMEM scratch (compute dtype) so a
    # large row tile doesn't churn register allocation and the second matmul
    # reads half the bytes.
    h = jnp.dot(x_ref[...], w1_ref[...], preferred_element_type=jnp.float32)
    h_ref[...] = jnp.maximum(h + b1_ref[...], 0.0).astype(h_ref.dtype)

    # y = hidden @ W2 + b2 (f32 accumulation, bias add in f32).
    y = jnp.dot(h_ref[...], w2_ref[...], preferred_element_type=jnp.float32)
    y = y + b2_ref[...]

    if training:
        # Inverted dropout: keep iff bits >= round(p * 2^32).  Pure uint32
        # compare -- no int->float cast, no shift, no 1/2^24 scale.
        thresh = min(int(round(dropout_p * (2.0 ** 32))), 2 ** 32 - 1)
        keep = bits_ref[...] >= jnp.uint32(thresh)
        y = jnp.where(keep, y * (1.0 / (1.0 - dropout_p)), 0.0)
    # else: eval-mode dropout is the identity.

    o_ref[...] = y.astype(o_ref.dtype)


def feed_forward(x, w1, b1, w2, b2, *, key=None, training=False, dropout_p=0.1,
                 row_tile=256, use_bf16=True):
    """x: (B, T, C) float32.  Returns (B, T, C)."""
    B, T, C = x.shape
    H = w1.shape[1]
    M = B * T

    training = bool(training) and dropout_p > 0.0
    if training and not (0.0 < dropout_p < 1.0):
        raise ValueError("dropout_p must be in [0, 1) in training mode")

    compute_dtype = jnp.bfloat16 if use_bf16 else x.dtype
    itemsize = jnp.dtype(compute_dtype).itemsize

    x2 = x.reshape(M, C).astype(compute_dtype)
    w1c = w1.astype(compute_dtype)
    w2c = w2.astype(compute_dtype)
    b1_2 = b1.reshape(1, H).astype(jnp.float32)
    b2_2 = b2.reshape(1, C).astype(jnp.float32)

    # Large, MXU-friendly row tile; pad M up so the big tile always runs.
    tm = min(row_tile, _round_up(M, 8))
    Mp = _round_up(M, tm)
    if Mp != M:
        x2 = jnp.pad(x2, ((0, Mp - M), (0, 0)))
    grid = (Mp // tm,)

    in_specs = [
        pl.BlockSpec((tm, C), lambda i: (i, 0)),   # x rows (streamed)
        # Weights/biases have a constant index_map -> fetched once, resident.
        pl.BlockSpec((C, H), lambda i: (0, 0)),    # W1 (full)
        pl.BlockSpec((1, H), lambda i: (0, 0)),    # b1
        pl.BlockSpec((H, C), lambda i: (0, 0)),    # W2 (full)
        pl.BlockSpec((1, C), lambda i: (0, 0)),    # b2
    ]
    args = [x2, w1c, b1_2, w2c, b2_2]

    if training:
        if key is None:
            key = jax.random.PRNGKey(0)
        bits = jax.random.bits(key, (Mp, C), dtype=jnp.uint32)
        in_specs.append(pl.BlockSpec((tm, C), lambda i: (i, 0)))  # dropout bits
        args.append(bits)

    # VMEM budget: double-buffered weights + streamed tiles + hidden scratch.
    weight_bytes = 2 * (C * H + H * C) * itemsize
    stream_bytes = 2 * tm * C * (itemsize + 4 + (4 if training else 0))
    bias_bytes = 2 * (H + C) * 4
    scratch_bytes = tm * H * itemsize
    need = weight_bytes + stream_bytes + bias_bytes + scratch_bytes
    vmem_limit = min(64 * 1024 * 1024, max(32 * 1024 * 1024, int(need * 1.5)))

    flops = 4 * Mp * C * H  # two matmuls, 2*M*K*N each
    bytes_accessed = (Mp * C * itemsize                       # x
                      + (C * H + H * C) * itemsize            # weights
                      + (H + C) * 4                           # biases
                      + Mp * C * 4                            # output
                      + (Mp * C * 4 if training else 0))      # dropout bits
    cost = pl.CostEstimate(flops=int(flops), transcendentals=0,
                           bytes_accessed=int(bytes_accessed))

    kernel = functools.partial(_ffn_kernel, training=training,
                               dropout_p=dropout_p)

    out2 = pl.pallas_call(
        kernel,
        out_shape=jax.ShapeDtypeStruct((Mp, C), x.dtype),
        grid_spec=pltpu.PrefetchScalarGridSpec(
            num_scalar_prefetch=0,
            grid=grid,
            in_specs=in_specs,
            out_specs=pl.BlockSpec((tm, C), lambda i: (i, 0)),
            scratch_shapes=[pltpu.VMEM((tm, H), compute_dtype)],
        ),
        compiler_params=pltpu.CompilerParams(
            # Row tiles are independent -> shard across TensorCores.
            dimension_semantics=("parallel",),
            vmem_limit_bytes=vmem_limit,
        ),
        cost_estimate=cost,
    )(*args)

    return out2[:M].reshape(B, T, C)


def init_params(key, n_embed):
    """Deterministic init mimicking torch.nn.Linear defaults (U[-1/sqrt(fan_in), +])."""
    h = 4 * n_embed
    k1, k2, k3, k4 = jax.random.split(key, 4)
    lim1 = 1.0 / math.sqrt(n_embed)
    lim2 = 1.0 / math.sqrt(h)
    w1 = jax.random.uniform(k1, (n_embed, h), jnp.float32, -lim1, lim1)
    b1 = jax.random.uniform(k2, (h,), jnp.float32, -lim1, lim1)
    w2 = jax.random.uniform(k3, (h, n_embed), jnp.float32, -lim2, lim2)
    b2 = jax.random.uniform(k4, (n_embed,), jnp.float32, -lim2, lim2)
    return w1, b1, w2, b2


if __name__ == "__main__":
    key = jax.random.PRNGKey(0)
    k_x, k_p, k_drop = jax.random.split(key, 3)

    B, T, n_embed = 2, 8, 128  # small shapes; hidden = 4 * n_embed = 512
    x = jax.random.normal(k_x, (B, T, n_embed), jnp.float32)
    w1, b1, w2, b2 = init_params(k_p, n_embed)

    # Eval-mode forward (dropout = identity), checked against a pure-JAX ref
    # that uses the same bf16-matmul / f32-accumulate recipe as the kernel.
    y = feed_forward(x, w1, b1, w2, b2, training=False)
    y = jax.block_until_ready(y)

    bf = jnp.bfloat16
    x2 = x.reshape(-1, n_embed)
    h_ref = jnp.maximum(
        jnp.dot(x2.astype(bf), w1.astype(bf),
                preferred_element_type=jnp.float32) + b1, 0.0)
    ref = jnp.dot(h_ref.astype(bf), w2.astype(bf),
                  preferred_element_type=jnp.float32) + b2
    ref = ref.reshape(B, T, n_embed)
    assert jnp.allclose(y, ref, atol=2e-2, rtol=2e-2), "mismatch vs reference"

    # Training-mode forward (dropout mask from uint32 bits, deterministic key).
    y_train = feed_forward(x, w1, b1, w2, b2, key=k_drop, training=True)
    y_train = jax.block_until_ready(y_train)
    assert y_train.shape == x.shape

    print("KERNEL_OK")
</pallas_src>

<mosaic_0001>
module attributes {stable_mosaic.version = 11 : i64} {
  func.func @_ffn_kernel(%arg0: i32, %arg1: memref<16x128xbf16, #tpu.memory_space<vmem>>, %arg2: memref<128x512xbf16, #tpu.memory_space<vmem>>, %arg3: memref<1x512xf32, #tpu.memory_space<vmem>>, %arg4: memref<512x128xbf16, #tpu.memory_space<vmem>>, %arg5: memref<1x128xf32, #tpu.memory_space<vmem>>, %arg6: memref<16x128xf32, #tpu.memory_space<vmem>>, %arg7: memref<16x512xbf16, #tpu.memory_space<vmem>>) attributes {dimension_semantics = [#tpu.dimension_semantics<parallel>], iteration_bounds = array<i64: 1>, scalar_prefetch = 0 : i64, scratch_operands = 1 : i64, tpu.core_type = #tpu.core_type<tc>, window_params = [{transform_indices = @transform_0, window_bounds = array<i64: 16, 128>}, {pipeline_mode = #tpu.pipeline_mode<synchronous>, transform_indices = @transform_1, window_bounds = array<i64: 128, 512>}, {pipeline_mode = #tpu.pipeline_mode<synchronous>, transform_indices = @transform_2, window_bounds = array<i64: 1, 512>}, {pipeline_mode = #tpu.pipeline_mode<synchronous>, transform_indices = @transform_3, window_bounds = array<i64: 512, 128>}, {pipeline_mode = #tpu.pipeline_mode<synchronous>, transform_indices = @transform_4, window_bounds = array<i64: 1, 128>}, {transform_indices = @transform_5, window_bounds = array<i64: 16, 128>}]} {
    %c0 = arith.constant 0 : index
    %c0_0 = arith.constant 0 : index
    %0 = vector.load %arg1[%c0, %c0_0] : memref<16x128xbf16, #tpu.memory_space<vmem>>, vector<16x128xbf16>
    %c0_1 = arith.constant 0 : index
    %c0_2 = arith.constant 0 : index
    %1 = vector.load %arg2[%c0_1, %c0_2] : memref<128x512xbf16, #tpu.memory_space<vmem>>, vector<128x512xbf16>
    %cst = arith.constant dense<0.000000e+00> : vector<16x512xf32>
    %2 = tpu.matmul %0, %1, %cst {dimension_numbers = #tpu.dot_dimension_numbers<[1], [0], [0], [1], [0, 0, 1, 1], [], []>} : vector<16x128xbf16>, vector<128x512xbf16>, vector<16x512xf32> -> vector<16x512xf32>
    %c0_3 = arith.constant 0 : index
    %c0_4 = arith.constant 0 : index
    %3 = vector.load %arg3[%c0_3, %c0_4] : memref<1x512xf32, #tpu.memory_space<vmem>>, vector<1x512xf32>
    %4 = vector.broadcast %3 : vector<1x512xf32> to vector<16x512xf32>
    %5 = arith.addf %2, %4 : vector<16x512xf32>
    %cst_5 = arith.constant 0.000000e+00 : f32
    %6 = vector.broadcast %cst_5 : f32 to vector<16x512xf32>
    %7 = arith.maximumf %5, %6 : vector<16x512xf32>
    %8 = arith.truncf %7 : vector<16x512xf32> to vector<16x512xbf16>
    %c0_6 = arith.constant 0 : index
    %c0_7 = arith.constant 0 : index
    %9 = vector.load %arg7[%c0_6, %c0_7] : memref<16x512xbf16, #tpu.memory_space<vmem>>, vector<16x512xbf16>
    tpu.vector_store %arg7[%c0_6, %c0_7], %8 {strides = array<i32>} : memref<16x512xbf16, #tpu.memory_space<vmem>>, vector<16x512xbf16>,
    %c0_8 = arith.constant 0 : index
    %c0_9 = arith.constant 0 : index
    %10 = vector.load %arg7[%c0_8, %c0_9] : memref<16x512xbf16, #tpu.memory_space<vmem>>, vector<16x512xbf16>
    %c0_10 = arith.constant 0 : index
    %c0_11 = arith.constant 0 : index
    %11 = vector.load %arg4[%c0_10, %c0_11] : memref<512x128xbf16, #tpu.memory_space<vmem>>, vector<512x128xbf16>
    %cst_12 = arith.constant dense<0.000000e+00> : vector<16x128xf32>
    %12 = tpu.matmul %10, %11, %cst_12 {dimension_numbers = #tpu.dot_dimension_numbers<[1], [0], [0], [1], [0, 0, 1, 1], [], []>} : vector<16x512xbf16>, vector<512x128xbf16>, vector<16x128xf32> -> vector<16x128xf32>
    %c0_13 = arith.constant 0 : index
    %c0_14 = arith.constant 0 : index
    %13 = vector.load %arg5[%c0_13, %c0_14] : memref<1x128xf32, #tpu.memory_space<vmem>>, vector<1x128xf32>
    %14 = vector.broadcast %13 : vector<1x128xf32> to vector<16x128xf32>
    %15 = arith.addf %12, %14 : vector<16x128xf32>
    %c0_15 = arith.constant 0 : index
    %c0_16 = arith.constant 0 : index
    %16 = vector.load %arg6[%c0_15, %c0_16] : memref<16x128xf32, #tpu.memory_space<vmem>>, vector<16x128xf32>
    tpu.vector_store %arg6[%c0_15, %c0_16], %15 {strides = array<i32>} : memref<16x128xf32, #tpu.memory_space<vmem>>, vector<16x128xf32>,
    return
  }
  func.func @transform_0(%arg0: i32) -> (i32, i32) {
    %c0_i32 = arith.constant 0 : i32
    %c0_i32_0 = arith.constant 0 : i32
    return %arg0, %c0_i32 : i32, i32
  }
  func.func @transform_1(%arg0: i32) -> (i32, i32) {
    %c0_i32 = arith.constant 0 : i32
    %c0_i32_0 = arith.constant 0 : i32
    %c0_i32_1 = arith.constant 0 : i32
    return %c0_i32, %c0_i32_0 : i32, i32
  }
  func.func @transform_2(%arg0: i32) -> (i32, i32) {
    %c0_i32 = arith.constant 0 : i32
    %c0_i32_0 = arith.constant 0 : i32
    %c0_i32_1 = arith.constant 0 : i32
    return %c0_i32, %c0_i32_0 : i32, i32
  }
  func.func @transform_3(%arg0: i32) -> (i32, i32) {
    %c0_i32 = arith.constant 0 : i32
    %c0_i32_0 = arith.constant 0 : i32
    %c0_i32_1 = arith.constant 0 : i32
    return %c0_i32, %c0_i32_0 : i32, i32
  }
  func.func @transform_4(%arg0: i32) -> (i32, i32) {
    %c0_i32 = arith.constant 0 : i32
    %c0_i32_0 = arith.constant 0 : i32
    %c0_i32_1 = arith.constant 0 : i32
    return %c0_i32, %c0_i32_0 : i32, i32
  }
  func.func @transform_5(%arg0: i32) -> (i32, i32) {
    %c0_i32 = arith.constant 0 : i32
    %c0_i32_0 = arith.constant 0 : i32
    return %arg0, %c0_i32 : i32, i32
  }
}

</mosaic_0001>

<bundles_post_ra>
// kernel: tpu_custom_call.1
= control target key start
LH: loop header
LB: loop body
LE: loop exit
PB: predicated region body
PF: predicated region fallthrough
CT: control target
= control target key end

     0   :  { %10 = vsyncpa [#allocation4], 0  ;;  %s1196_s0 = inlined_call_operand.hbm [shape: bf16[16,128], index: 0, kind: input, shape index: {}]   ;;  %s1197_s1 = inlined_call_operand.hbm [shape: bf16[128,512], index: 1, kind: input, shape index: {}]   ;;  %s1198_s2 = inlined_call_operand.hbm [shape: f32[1,512], index: 2, kind: input, shape index: {}]   ;;  %s1199_s3 = inlined_call_operand.hbm [shape: bf16[512,128], index: 3, kind: input, shape index: {}]   ;;  %s1200_s4 = inlined_call_operand.vmem [shape: f32[1,128], index: 4, kind: input, shape index: {}]   ;;  %s1201_s5 = inlined_call_operand.hbm [shape: f32[16,128], index: 5, kind: output, shape index: {}]  }
   0x1   :  { %11 = vsyncpa [#allocation7], 0 }
   0x2   :  { %12 = vsyncpa [#allocation10], 0 }
   0x3   :  { %13 = vsyncpa [#allocation5], 0  ;;  %s1136_s18 = smov [#allocation6]  }
   0x4   :  { %s31_s19 = sshll.u32 %s1136_s18, 4  ;;  %s32_s19 = int_to_ptr.vmem [resolvable:$true] %s31_s19 }
   0x5   :  { %s1036_s20 = scalar_lea.vmem %s32_s19, 4096  ;;  %p1041_p1 = scmp.lt.s32.totalorder %s32_s19, %s32_s19 }
   0x6   :  { %p1037_p0 = scmp.ne.s32.totalorder %s32_s19, %s1036_s20  ;;  %p1042_p2 = scmp.lt.s32.totalorder %s1036_s20, %s1036_s20 }
   0x8   :  { %p1043_p3 = por %p1042_p2, %p1041_p1 }
   0xa   :  { %p1044_p4 = pnand %p1043_p3, %p1037_p0 }
   0xc   :  { %1047 = shalt.err (!%p1044_p4)
}
   0xd   :  { %s1137_s21 = smov 256   ;;  %s1138_s22 = smov 16  }
   0xe   :  { %37 = dma.hbm_to_vmem [thread:$0]  %s1197_s1, 4096, %s32_s19, [#allocation7], %s1137_s21, %s1137_s21, %s1138_s22  }
   0xf   :  { %s1139_s25 = smov [#allocation3]  }
  0x10   :  { %s19_s26 = sshll.u32 %s1139_s25, 4  ;;  %s20_s26 = int_to_ptr.vmem [resolvable:$true] %s19_s26 }
  0x11   :  { %s1056_s27 = scalar_lea.vmem %s20_s26, 128  ;;  %p1061_p6 = scmp.lt.s32.totalorder %s20_s26, %s20_s26 }
  0x12   :  { %p1057_p5 = scmp.ne.s32.totalorder %s20_s26, %s1056_s27  ;;  %p1062_p7 = scmp.lt.s32.totalorder %s1056_s27, %s1056_s27 }
  0x14   :  { %p1063_p8 = por %p1062_p7, %p1061_p6 }
  0x16   :  { %p1064_p9 = pnand %p1063_p8, %p1057_p5 }
  0x18   :  { %1067 = shalt.err (!%p1064_p9)
}
  0x19   :  { %s1140_s28 = smov 64   ;;  %s1141_s29 = smov 4  }
  0x1a   :  { %25 = dma.hbm_to_vmem [thread:$0]  %s1196_s0, 128, %s20_s26, [#allocation4], %s1140_s28, %s1140_s28, %s1141_s29  }
  0x1b   :  { %s1142_s7 = smov [#allocation8]   ;;  %s1143_s9 = smov [#allocation9]  }
  0x1c   :  { %s44_s8 = sshll.u32 %s1142_s7, 4  ;;  %s53_s1 = sshll.u32 %s1143_s9, 4  ;;  %s45_s8 = int_to_ptr.vmem [resolvable:$true] %s44_s8  ;;  %s54_s1 = int_to_ptr.vmem [resolvable:$true] %s53_s1 }
  0x1d   :  { %s1076_s10 = scalar_lea.vmem %s45_s8, 64  ;;  %p1081_p11 = scmp.lt.s32.totalorder %s45_s8, %s45_s8 }
  0x1e   :  { %p1077_p10 = scmp.ne.s32.totalorder %s45_s8, %s1076_s10  ;;  %p1082_p12 = scmp.lt.s32.totalorder %s1076_s10, %s1076_s10 }
  0x20   :  { %p1083_p13 = por %p1082_p12, %p1081_p11 }
  0x22   :  { %p1084_p0 = pnand %p1083_p13, %p1077_p10 }
  0x24   :  { %1087 = shalt.err (!%p1084_p0)
}
  0x25   :  { %47 = dma.hbm_to_vmem [thread:$0]  %s1198_s2, 64, %s45_s8, [#allocation7]  }
  0x26   :  { %s1096_s13 = scalar_lea.vmem %s54_s1, 4096  ;;  %p1101_p2 = scmp.lt.s32.totalorder %s54_s1, %s54_s1 }
  0x27   :  { %p1097_p1 = scmp.ne.s32.totalorder %s54_s1, %s1096_s13  ;;  %p1102_p3 = scmp.lt.s32.totalorder %s1096_s13, %s1096_s13 }
  0x29   :  { %p1103_p4 = por %p1102_p3, %p1101_p2 }
  0x2b   :  { %p1104_p5 = pnand %p1103_p4, %p1097_p1 }
  0x2d   :  { %1107 = shalt.err (!%p1104_p5)
}
  0x2e   :  { %59 = dma.hbm_to_vmem [thread:$0]  %s1199_s3, 4096, %s54_s1, [#allocation10], %s1140_s28, %s1140_s28, %s1141_s29  }
  0x2f   :  { %1128 = dma.done.wait [#allocation4], 128  }
  0x30   :  { %1129 = vsyncadd [#allocation4], 4294967168 }
  0x31   :  { %1130 = dma.done.wait [#allocation7], 4160  }
  0x32   :  { %1131 = vsyncadd [#allocation7], 4294963136 }
  0x33   :  { %1132 = dma.done.wait [#allocation10], 4096  }
  0x34   :  { %1133 = vsyncadd [#allocation10], 4294963200  ;;  %v1144_v0 = vmov 0   ;;  %v947_v1 = vld [vmem:[#allocation6 + $0xe4] ss:$16 sps:$4 sm:$0xff]   ;;  %v996_v33 = vld [vmem:[#allocation9 + $0x78] sm:$0xff]  }
  0x35   :  { %329 = vmatprep.mubr.bf16.mxu0 %v1144_v0  ;;  %372 = vmatprep.mubr.bf16.mxu1 %v1144_v0  ;;  %v949_v2 = vld [vmem:[#allocation6 + $0xec] ss:$16 sps:$4 sm:$0xff]   ;;  %v951_v3 = vld [vmem:[#allocation6 + $0xe0] ss:$16 sps:$4 sm:$0xff]   ;;  %v952_v4 = vld [vmem:[#allocation6 + $0xe8] ss:$16 sps:$4 sm:$0xff]  }
  0x36   :  { %297 = vmatprep.subr.bf16.mxu0 %v947_v1  ;;  %340 = vmatprep.subr.bf16.mxu1 %v949_v2  ;;  %v953_v5 = vld [vmem:[#allocation6 + $0xc4] ss:$16 sps:$4 sm:$0xff]   ;;  %v955_v6 = vld [vmem:[#allocation6 + $0xcc] ss:$16 sps:$4 sm:$0xff]   ;;  %v957_v7 = vld [vmem:[#allocation6 + $0xc0] ss:$16 sps:$4 sm:$0xff]   ;;  %v111_v2 = vlaneseq }
  0x37   :  { %298 = vmatpush1.bf16.msra.mxu0 %v951_v3  ;;  %341 = vmatpush1.bf16.msra.mxu1 %v952_v4  ;;  %v958_v8 = vld [vmem:[#allocation6 + $0xc8] ss:$16 sps:$4 sm:$0xff]   ;;  %v959_v9 = vld [vmem:[#allocation6 + $0xa4] ss:$16 sps:$4 sm:$0xff]   ;;  %v961_v10 = vld [vmem:[#allocation6 + $0xac] ss:$16 sps:$4 sm:$0xff]  }
  0x38   :  { %299 = vmatprep.subr.bf16.mxu0 %v953_v5  ;;  %342 = vmatprep.subr.bf16.mxu1 %v955_v6  ;;  %v963_v11 = vld [vmem:[#allocation6 + $0xa0] ss:$16 sps:$4 sm:$0xff]   ;;  %v964_v12 = vld [vmem:[#allocation6 + $0xa8] ss:$16 sps:$4 sm:$0xff]   ;;  %v965_v13 = vld [vmem:[#allocation6 + $0x84] ss:$16 sps:$4 sm:$0xff]  }
  0x39   :  { %v967_v14 = vld [vmem:[#allocation6 + $0x8c] ss:$16 sps:$4 sm:$0xff]   ;;  %v969_v15 = vld [vmem:[#allocation6 + $0x80] ss:$16 sps:$4 sm:$0xff]   ;;  %v970_v16 = vld [vmem:[#allocation6 + $0x88] ss:$16 sps:$4 sm:$0xff]  }
  0x3a   :  { %v971_v17 = vld [vmem:[#allocation6 + $0x64] ss:$16 sps:$4 sm:$0xff]   ;;  %v973_v18 = vld [vmem:[#allocation6 + $0x6c] ss:$16 sps:$4 sm:$0xff]   ;;  %v975_v19 = vld [vmem:[#allocation6 + $0x60] ss:$16 sps:$4 sm:$0xff]  }
  0x3b   :  { %300 = vmatpush1.bf16.msra.mxu0 %v957_v7  ;;  %343 = vmatpush1.bf16.msra.mxu1 %v958_v8  ;;  %v976_v20 = vld [vmem:[#allocation6 + $0x68] ss:$16 sps:$4 sm:$0xff]   ;;  %v977_v21 = vld [vmem:[#allocation6 + $0x44] ss:$16 sps:$4 sm:$0xff]   ;;  %v979_v22 = vld [vmem:[#allocation6 + $0x4c] ss:$16 sps:$4 sm:$0xff]  }
  0x3c   :  { %301 = vmatprep.subr.bf16.mxu0 %v959_v9  ;;  %344 = vmatprep.subr.bf16.mxu1 %v961_v10  ;;  %v981_v23 = vld [vmem:[#allocation6 + $0x40] ss:$16 sps:$4 sm:$0xff]   ;;  %v982_v24 = vld [vmem:[#allocation6 + $0x48] ss:$16 sps:$4 sm:$0xff]   ;;  %v983_v25 = vld [vmem:[#allocation6 + $0x24] ss:$16 sps:$4 sm:$0xff]  }
  0x3d   :  { %v985_v26 = vld [vmem:[#allocation6 + $0x2c] ss:$16 sps:$4 sm:$0xff]   ;;  %v987_v27 = vld [vmem:[#allocation6 + $0x20] ss:$16 sps:$4 sm:$0xff]   ;;  %v988_v28 = vld [vmem:[#allocation6 + $0x28] ss:$16 sps:$4 sm:$0xff]  }
  0x3e   :  { %v989_v29 = vld [vmem:[#allocation6 + $0x4] ss:$16 sps:$4 sm:$0xff]   ;;  %v991_v30 = vld [vmem:[#allocation6 + $0xc] ss:$16 sps:$4 sm:$0xff]   ;;  %v993_v31 = vld [vmem:[#allocation6] ss:$16 sps:$4 sm:$0xff]  }
  0x3f   :  { %302 = vmatpush1.bf16.msra.mxu0 %v963_v11  ;;  %345 = vmatpush1.bf16.msra.mxu1 %v964_v12  ;;  %v994_v32 = vld [vmem:[#allocation6 + $0x8] ss:$16 sps:$4 sm:$0xff]   ;;  %v997_v35 = vld [vmem:[#allocation9 + $0xf8] sm:$0xff]   ;;  %v1004_v42 = vld [vmem:[#allocation9 + $0x68] sm:$0xff]   ;;  %v112_v3 = vshrl.u32 %v111_v2, 7  ;;  %s1145_s15 = smov [#allocation11]  }
  0x40   :  { %303 = vmatprep.subr.bf16.mxu0 %v965_v13  ;;  %346 = vmatprep.subr.bf16.mxu1 %v967_v14  ;;  %v995_v34 = vld [vmem:[#allocation3] sm:$0xff]   ;;  %v1005_v43 = vld [vmem:[#allocation9 + $0xe8] sm:$0xff]   ;;  %v1008_v46 = vld [vmem:[#allocation9 + $0x60] sm:$0xff]   ;;  %s795_s16 = sshll.u32 %s1145_s15, 4  ;;  %s796_s16 = int_to_ptr.vmem [resolvable:$true] %s795_s16 }
  0x41   :  { %v998_v36 = vld [vmem:[#allocation9 + $0x38] sm:$0xff]   ;;  %v1000_v38 = vld [vmem:[#allocation9 + $0x70] sm:$0xff]   ;;  %v1006_v44 = vld [vmem:[#allocation9 + $0x28] sm:$0xff]   ;;  %v117_v4 = vsub.s32 1, %v112_v3  ;;  %v125_v5 = vsub.s32 3, %v112_v3  ;;  %v113_v6 = vsub.s32 0, %v112_v3  ;;  %p1113_p7 = scmp.lt.s32.totalorder %s796_s16, %s796_s16 }
  0x42   :  { %v999_v37 = vld [vmem:[#allocation9 + $0xb8] sm:$0xff]   ;;  %v1001_v39 = vld [vmem:[#allocation9 + $0xf0] sm:$0xff]   ;;  %v1007_v45 = vld [vmem:[#allocation9 + $0xa8] sm:$0xff]   ;;  %v121_v7 = vsub.s32 2, %v112_v3 }
  0x43   :  { %304 = vmatpush1.bf16.msra.mxu0 %v969_v15  ;;  %347 = vmatpush1.bf16.msra.mxu1 %v970_v16  ;;  %v1002_v40 = vld [vmem:[#allocation9 + $0x30] sm:$0xff]   ;;  %v1009_v47 = vld [vmem:[#allocation9 + $0xe0] sm:$0xff]   ;;  %v1012_v50 = vld [vmem:[#allocation9 + $0x58] sm:$0xff]  }
  0x44   :  { %305 = vmatprep.subr.bf16.mxu0 %v971_v17  ;;  %348 = vmatprep.subr.bf16.mxu1 %v973_v18  ;;  %v1003_v41 = vld [vmem:[#allocation9 + $0xb0] sm:$0xff]   ;;  %v1010_v48 = vld [vmem:[#allocation9 + $0x20] sm:$0xff]   ;;  %v1013_v51 = vld [vmem:[#allocation9 + $0xd8] sm:$0xff]  }
  0x45   :  { %v1011_v49 = vld [vmem:[#allocation9 + $0xa0] sm:$0xff]   ;;  %v1014_v52 = vld [vmem:[#allocation9 + $0x18] sm:$0xff]   ;;  %v1016_v54 = vld [vmem:[#allocation9 + $0x50] sm:$0xff]  }
  0x46   :  { %v1015_v53 = vld [vmem:[#allocation9 + $0x98] sm:$0xff]   ;;  %v1017_v55 = vld [vmem:[#allocation9 + $0xd0] sm:$0xff]   ;;  %v1020_v58 = vld [vmem:[#allocation9 + $0x48] sm:$0xff]  }
  0x47   :  { %306 = vmatpush1.bf16.msra.mxu0 %v975_v19  ;;  %349 = vmatpush1.bf16.msra.mxu1 %v976_v20  ;;  %v1018_v56 = vld [vmem:[#allocation9 + $0x10] sm:$0xff]   ;;  %v1021_v59 = vld [vmem:[#allocation9 + $0xc8] sm:$0xff]   ;;  %v1024_v62 = vld [vmem:[#allocation9 + $0x40] sm:$0xff]  }
  0x48   :  { %307 = vmatprep.subr.bf16.mxu0 %v977_v21  ;;  %350 = vmatprep.subr.bf16.mxu1 %v979_v22  ;;  %v1019_v57 = vld [vmem:[#allocation9 + $0x90] sm:$0xff]   ;;  %v1022_v60 = vld [vmem:[#allocation9 + $0x8] sm:$0xff]   ;;  %v1025_v63 = vld [vmem:[#allocation9 + $0xc0] sm:$0xff]  }
  0x49   :  { %v1023_v61 = vld [vmem:[#allocation9 + $0x88] sm:$0xff]   ;;  %v1026_v0 = vld [vmem:[#allocation9] sm:$0xff]   ;;  %v109_v8 = vld [vmem:[#allocation8] sm:$0xf] }
  0x4a   :  { %v1027_v1 = vld [vmem:[#allocation9 + $0x80] sm:$0xff]   ;;  %v118_v11 = vrot.slane %v109_v8, %v117_v4  ;;  %v126_v12 = vrot.slane %v109_v8, %v125_v5  ;;  %v114_v13 = vrot.slane %v109_v8, %v113_v6  ;;  %v122_v14 = vrot.slane %v109_v8, %v121_v7 }
  0x4b   :  { %308 = vmatpush1.bf16.msra.mxu0 %v981_v23  ;;  %351 = vmatpush1.bf16.msra.mxu1 %v982_v24 }
  0x4c   :  { %309 = vmatprep.subr.bf16.mxu0 %v983_v25  ;;  %352 = vmatprep.subr.bf16.mxu1 %v985_v26 }
  0x4f   :  { %310 = vmatpush1.bf16.msra.mxu0 %v987_v27  ;;  %353 = vmatpush1.bf16.msra.mxu1 %v988_v28 }
  0x50   :  { %311 = vmatprep.subr.bf16.mxu0 %v989_v29  ;;  %354 = vmatprep.subr.bf16.mxu1 %v991_v30 }
  0x53   :  { %312 = vmatpush1.bf16.msra.mxu0 %v993_v31  ;;  %355 = vmatpush1.bf16.msra.mxu1 %v994_v32 }
  0x54   :  { %891 = vmatprep.subr.bf16.mxu0 %v996_v33  ;;  %913 = vmatprep.subr.bf16.mxu1 %v997_v35 }
  0x56   :  { %330 = vmatmul.mubr.bf16.vlgmr.msra.gmra.mxu0 %v995_v34  ;;  %373 = vmatmul.mubr.bf16.vlgmr.msra.gmra.mxu1 %v995_v34 }
  0x57   :  { %892 = vmatpush3.bf16.msra.mxu0 %v998_v36  ;;  %914 = vmatpush3.bf16.msra.mxu1 %v999_v37 }
  0x58   :  { %893 = vmatprep.subr.bf16.mxu0 %v1000_v38  ;;  %915 = vmatprep.subr.bf16.mxu1 %v1001_v39 }
  0x5b   :  { %894 = vmatpush3.bf16.msra.mxu0 %v1002_v40  ;;  %916 = vmatpush3.bf16.msra.mxu1 %v1003_v41 }
  0x5c   :  { %895 = vmatprep.subr.bf16.mxu0 %v1004_v42  ;;  %917 = vmatprep.subr.bf16.mxu1 %v1005_v43  ;;  %v846_v43 = vld [vmem:[%s1200_s4] ss:$0 sm:$0xff]  ;;  %s1108_s4 = scalar_lea.vmem %s796_s16, 256 }
  0x5d   :  { %p1109_p6 = scmp.ne.s32.totalorder %s796_s16, %s1108_s4  ;;  %p1114_p8 = scmp.lt.s32.totalorder %s1108_s4, %s1108_s4 }
  0x5f   :  { %896 = vmatpush3.bf16.msra.mxu0 %v1006_v44  ;;  %918 = vmatpush3.bf16.msra.mxu1 %v1007_v45  ;;  %p1115_p9 = por %p1114_p8, %p1113_p7 }
  0x60   :  { %897 = vmatprep.subr.bf16.mxu0 %v1008_v46  ;;  %919 = vmatprep.subr.bf16.mxu1 %v1009_v47 }
  0x61   :  { %p1116_p10 = pnand %p1115_p9, %p1109_p6 }
  0x63   :  { %898 = vmatpush3.bf16.msra.mxu0 %v1010_v48  ;;  %920 = vmatpush3.bf16.msra.mxu1 %v1011_v49 }
  0x64   :  { %899 = vmatprep.subr.bf16.mxu0 %v1012_v50  ;;  %921 = vmatprep.subr.bf16.mxu1 %v1013_v51 }
  0x67   :  { %900 = vmatpush3.bf16.msra.mxu0 %v1014_v52  ;;  %922 = vmatpush3.bf16.msra.mxu1 %v1015_v53 }
  0x68   :  { %901 = vmatprep.subr.bf16.mxu0 %v1016_v54  ;;  %923 = vmatprep.subr.bf16.mxu1 %v1017_v55 }
  0x6b   :  { %902 = vmatpush3.bf16.msra.mxu0 %v1018_v56  ;;  %924 = vmatpush3.bf16.msra.mxu1 %v1019_v57 }
  0x6c   :  { %903 = vmatprep.subr.bf16.mxu0 %v1020_v58  ;;  %925 = vmatprep.subr.bf16.mxu1 %v1021_v59 }
  0x6f   :  { %904 = vmatpush3.bf16.msra.mxu0 %v1022_v60  ;;  %926 = vmatpush3.bf16.msra.mxu1 %v1023_v61 }
  0x70   :  { %905 = vmatprep.subr.bf16.mxu0 %v1024_v62  ;;  %927 = vmatprep.subr.bf16.mxu1 %v1025_v63 }
  0x73   :  { %906 = vmatpush3.bf16.msra.mxu0 %v1026_v0  ;;  %928 = vmatpush3.bf16.msra.mxu1 %v1027_v1 }
 0x116   :  { %v331_v9 = vpop.f32.mrf.mxu0  ;;  %v374_v10 = vpop.f32.mrf.mxu1 }
 0x117   :  { %v332_v23 = vadd.f32 %v331_v9, %v114_v13  ;;  %v375_v24 = vadd.f32 %v374_v10, %v122_v14 }
 0x118   :  { %v333_v15 = vpop.f32.mrf.mxu0  ;;  %v376_v16 = vpop.f32.mrf.mxu1 }
 0x119   :  { %v334_v19 = vadd.f32 %v333_v15, %v118_v11  ;;  %v377_v20 = vadd.f32 %v376_v16, %v126_v12  ;;  %v383_v35 = vmax.f32 %v332_v23, 0.0  ;;  %v385_v36 = vmax.f32 %v375_v24, 0.0 }
 0x11a   :  { %v335_v17 = vpop.f32.mrf.mxu0  ;;  %v378_v18 = vpop.f32.mrf.mxu1 }
 0x11b   :  { %v336_v21 = vadd.f32 %v335_v17, %v114_v13  ;;  %v379_v22 = vadd.f32 %v378_v18, %v122_v14  ;;  %v384_v31 = vmax.f32 %v334_v19, 0.0  ;;  %v386_v32 = vmax.f32 %v377_v20, 0.0 }
 0x11c   :  { %v337_v25 = vpop.f32.mrf.mxu0  ;;  %v380_v26 = vpop.f32.mrf.mxu1 }
 0x11d   :  { %v338_v27 = vadd.f32 %v337_v25, %v118_v11  ;;  %v381_v28 = vadd.f32 %v380_v26, %v126_v12  ;;  %v387_v29 = vmax.f32 %v336_v21, 0.0  ;;  %v389_v30 = vmax.f32 %v379_v22, 0.0 }
 0x11f   :  { %v388_v33 = vmax.f32 %v338_v27, 0.0  ;;  %v390_v34 = vmax.f32 %v381_v28, 0.0  ;;  %v887_v39 = vpack.c.bf16 %v387_v29, %v383_v35  ;;  %v889_v40 = vpack.c.bf16 %v389_v30, %v385_v36 }
 0x121   :  { %v888_v37 = vpack.c.bf16 %v388_v33, %v384_v31  ;;  %v890_v38 = vpack.c.bf16 %v390_v34, %v386_v32 }
 0x123   :  { %738 = vmatprep.mubr.bf16.mxu0 %v888_v37  ;;  %779 = vmatprep.mubr.bf16.mxu1 %v890_v38 }
 0x124   :  { %739 = vmatmul.mubr.bf16.vlgmr.msra.gmra.mxu0 %v887_v39  ;;  %780 = vmatmul.mubr.bf16.vlgmr.msra.gmra.mxu1 %v889_v40 }
 0x1e4   :  { %v907_v41 = vpop.f32.mrf.mxu0  ;;  %v929_v42 = vpop.f32.mrf.mxu1 }
 0x1e6   :  { %v908_v44 = vpop.f32.mrf.mxu0  ;;  %v930_v45 = vpop.f32.mrf.mxu1 }
 0x1e7   :  { %v909_v46 = vadd.f32 %v908_v44, %v907_v41  ;;  %v931_v50 = vadd.f32 %v930_v45, %v929_v42 }
 0x1e8   :  { %v910_v47 = vpop.f32.mrf.mxu0  ;;  %v932_v48 = vpop.f32.mrf.mxu1 }
 0x1e9   :  { %v741_v49 = vadd.f32 %v909_v46, %v846_v43 }
 0x1ea   :  { %v911_v51 = vpop.f32.mrf.mxu0  ;;  %v933_v52 = vpop.f32.mrf.mxu1 }
 0x1eb   :  { %v782_v53 = vadd.f32 %v931_v50, %v741_v49  ;;  %v912_v54 = vadd.f32 %v911_v51, %v910_v47  ;;  %v934_v56 = vadd.f32 %v933_v52, %v932_v48 }
 0x1ed   :  { %788 = vst [vmem:[#allocation11] sm:$0xff] %v782_v53  ;;  %v744_v55 = vadd.f32 %v912_v54, %v846_v43 }
 0x1ef   :  { %v785_v57 = vadd.f32 %v934_v56, %v744_v55 }
 0x1f1   :  { %789 = vst [vmem:[#allocation11 + $0x8] sm:$0xff] %v785_v57 }
 0x1f2   :  { %1119 = shalt.err (!%p1116_p10)
}
 0x1f3   :  { %s1146_s17 = smov 128   ;;  %s1147_s18 = smov 8  }
 0x1f4   :  { %801 = dma.vmem_to_hbm [thread:$0]  %s796_s16, 256, %s1201_s5, [#allocation5], %s1146_s17, %s1146_s17, %s1147_s18  }
 0x1f5   :  { %1134 = dma.done.wait [#allocation5], 256  }
 0x1f6   :  { %1135 = vsyncadd [#allocation5], 4294967040 }
 0x1f7   :  { %805 = vsyncpa [#allocation4], 1 }
 0x1f8   :  { %806 = vsyncpa [#allocation7], 1 }
 0x1f9   :  { %807 = vsyncpa [#allocation10], 1 }
 0x1fa   :  { %808 = vsyncpa [#allocation5], 1 }

</bundles_post_ra>
